<compile_context>
chip_gen: v7x
topology: tpu7x:2x2x1
jax: 0.10.0
libtpu: 0.0.40
codegen_flags: <defaults>
</compile_context>

<pallas_src>
import jax
import jax.numpy as jnp
from jax import lax
from jax.experimental import pallas as pl
from jax.experimental.pallas import tpu as pltpu

EPS = 1e-10


# --------------------------------------------------------------------------
# Tile / budget selection
# --------------------------------------------------------------------------
def _round_up(x, n):
    return ((x + n - 1) // n) * n


def _hw_budget():
    """(target bytes per input block, vmem_limit_bytes) for this generation."""
    # Conservative defaults are safe on every generation (incl. v7x's 64 MiB VMEM).
    target, limit = 2 * 1024 * 1024, 40 * 1024 * 1024
    try:
        vmem = pltpu.get_tpu_info().vmem_capacity_bytes
        if vmem is not None and vmem >= 96 * 1024 * 1024:
            # v5e / v6e: 128 MiB physical VMEM -> go big, fewer grid steps.
            target, limit = 8 * 1024 * 1024, 64 * 1024 * 1024
    except Exception:
        pass
    return target, limit


def _choose_tiles(B, C, itemsize, target_bytes):
    """Pick (tile_b, tile_c).  tile_c == C means 'no C tiling' (path A)."""
    full_c_rows = target_bytes // max(C * itemsize, 1)
    if full_c_rows >= 8:
        # Path A: a block spans the whole class dim; tile only over batch rows.
        tile_b = max(8, min(4096, (full_c_rows // 8) * 8))
        if B <= 8:
            tile_b = B
        else:
            tile_b = min(tile_b, _round_up(B, 8))
            if B >= 16 and tile_b >= B:
                # Guarantee >= 2 batch tiles so the "parallel" axis can shard
                # across both v7x TensorCores (negligible cost elsewhere).
                tile_b = _round_up(-(-B // 2), 8)
        return tile_b, C
    # Path B: very wide C -> tile the class axis too and accumulate.
    tile_b = 8 if B >= 8 else B
    tile_c = 128
    while tile_c * 2 * tile_b * itemsize <= target_bytes:
        tile_c *= 2
    return tile_b, tile_c


# --------------------------------------------------------------------------
# Kernels
# --------------------------------------------------------------------------
def _js_terms(p_ref, q_ref):
    p = p_ref[...].astype(jnp.float32)
    q = q_ref[...].astype(jnp.float32)
    s = p + q
    log_m = jnp.log(0.5 * s + EPS)
    # p*(log(p+eps)-log(m+eps)) + q*(log(q+eps)-log(m+eps))
    return p * jnp.log(p + EPS) + q * jnp.log(q + EPS) - s * log_m


def _js_kernel_full(p_ref, q_ref, o_ref):
    """Path A: block covers the full class dim; one reduce per block."""
    terms = _js_terms(p_ref, q_ref)
    o_ref[...] = 0.5 * jnp.sum(terms, axis=1, keepdims=True)


def _sum_lane_groups(x, width):
    """(rows, width) -> (rows, 128) via aligned 128-lane VALU adds (no XLU)."""
    while width > 128 and width % 256 == 0:
        width //= 2
        x = x[:, :width] + x[:, width:2 * width]
    if width > 128:  # only reachable with unusual manual tile_c overrides
        r = x[:, :128]
        for j in range(1, width // 128):
            r = r + x[:, j * 128:(j + 1) * 128]
        x = r
    return x


def _make_js_kernel_tiled(C, tile_c):
    """Path B: class axis is tiled; accumulate 128-lane partials in VMEM."""

    def kernel(p_ref, q_ref, o_ref, acc_ref):
        ci = pl.program_id(1)

        @pl.when(ci == 0)
        def _():
            acc_ref[...] = jnp.zeros_like(acc_ref)

        terms = _js_terms(p_ref, q_ref)

        if C % tile_c != 0:
            # Mask the ragged C tail (no wrapper-side padding): garbage -> 0.
            col = ci * tile_c + lax.broadcasted_iota(jnp.int32, terms.shape, 1)
            terms = jnp.where(col < C, terms, 0.0)

        acc_ref[...] += _sum_lane_groups(terms, tile_c)

        @pl.when(ci == pl.num_programs(1) - 1)
        def _():
            o_ref[...] = 0.5 * jnp.sum(acc_ref[...], axis=1, keepdims=True)

    return kernel


# --------------------------------------------------------------------------
# Wrapper
# --------------------------------------------------------------------------
def jensen_shannon(p, q, *, tile_b=None, tile_c=None):
    """p, q: (B, C) probability arrays.  Returns (B,) JS divergence per row."""
    B, C = p.shape
    assert q.shape == (B, C)
    if q.dtype != p.dtype:
        q = q.astype(p.dtype)

    target_bytes, vmem_limit = _hw_budget()
    itemsize = jnp.dtype(p.dtype).itemsize
    auto_b, auto_c = _choose_tiles(B, C, itemsize, target_bytes)
    tile_b = auto_b if tile_b is None else tile_b
    tile_c = auto_c if tile_c is None else tile_c

    grid_b = pl.cdiv(B, tile_b)

    if tile_c >= C:
        # Path A: 1-D grid over batch tiles, full class dim per block.
        out = pl.pallas_call(
            _js_kernel_full,
            out_shape=jax.ShapeDtypeStruct((B, 1), jnp.float32),
            grid_spec=pltpu.PrefetchScalarGridSpec(
                num_scalar_prefetch=0,
                grid=(grid_b,),
                in_specs=[
                    pl.BlockSpec((tile_b, C), lambda i: (i, 0)),
                    pl.BlockSpec((tile_b, C), lambda i: (i, 0)),
                ],
                out_specs=pl.BlockSpec((tile_b, 1), lambda i: (i, 0)),
            ),
            compiler_params=pltpu.CompilerParams(
                dimension_semantics=("parallel",),
                vmem_limit_bytes=vmem_limit,
            ),
        )(p, q)
    else:
        assert tile_c % 128 == 0, "tile_c must be a multiple of 128"
        out = pl.pallas_call(
            _make_js_kernel_tiled(C, tile_c),
            out_shape=jax.ShapeDtypeStruct((B, 1), jnp.float32),
            grid_spec=pltpu.PrefetchScalarGridSpec(
                num_scalar_prefetch=0,
                grid=(grid_b, pl.cdiv(C, tile_c)),
                in_specs=[
                    pl.BlockSpec((tile_b, tile_c), lambda i, c: (i, c)),
                    pl.BlockSpec((tile_b, tile_c), lambda i, c: (i, c)),
                ],
                out_specs=pl.BlockSpec((tile_b, 1), lambda i, c: (i, 0)),
                scratch_shapes=[pltpu.VMEM((tile_b, 128), jnp.float32)],
            ),
            compiler_params=pltpu.CompilerParams(
                # Batch axis shards across TensorCores; class axis carries the
                # accumulation so it must stay "arbitrary" (and last).
                dimension_semantics=("parallel", "arbitrary"),
                vmem_limit_bytes=vmem_limit,
            ),
        )(p, q)
    return out.reshape(B)


# --------------------------------------------------------------------------
# Reference + test
# --------------------------------------------------------------------------
def jensen_shannon_ref(p, q):
    # Pure-JAX reference mirroring the PyTorch module exactly.
    p = p.astype(jnp.float32)
    q = q.astype(jnp.float32)
    m = (p + q) / 2.0
    kl_pm = jnp.sum(p * jnp.log((p + EPS) / (m + EPS)), axis=1)
    kl_qm = jnp.sum(q * jnp.log((q + EPS) / (m + EPS)), axis=1)
    return 0.5 * kl_pm + 0.5 * kl_qm


def _make_probs(key, B, C):
    k1, k2 = jax.random.split(key)
    p = jax.nn.softmax(jax.random.normal(k1, (B, C), dtype=jnp.float32), axis=1)
    q = jax.nn.softmax(jax.random.normal(k2, (B, C), dtype=jnp.float32), axis=1)
    return p, q


if __name__ == "__main__":
    # Case 1 (path A): batch of 8 rows, 128 "classes".
    B, C = 8, 128
    p, q = _make_probs(jax.random.PRNGKey(0), B, C)
    out = jensen_shannon(p, q)
    jax.block_until_ready(out)
    ref = jensen_shannon_ref(p, q)
    assert out.shape == (B,)
    assert jnp.allclose(out, ref, atol=2e-5, rtol=1e-4), (out, ref)

    # Case 2 (path A, ragged): partial batch block, non-128-multiple C.
    B2, C2 = 10, 200
    p2, q2 = _make_probs(jax.random.PRNGKey(1), B2, C2)
    out2 = jensen_shannon(p2, q2)
    jax.block_until_ready(out2)
    ref2 = jensen_shannon_ref(p2, q2)
    assert out2.shape == (B2,)
    assert jnp.allclose(out2, ref2, atol=2e-5, rtol=1e-4), (out2, ref2)

    # Case 3 (forced path B): C tiling + tail masking + scratch accumulation.
    out3 = jensen_shannon(p2, q2, tile_b=8, tile_c=128)
    jax.block_until_ready(out3)
    assert jnp.allclose(out3, ref2, atol=2e-5, rtol=1e-4), (out3, ref2)

    # Case 4 (path A, B >= 16): exercises the >=2-batch-tile split rule.
    B4, C4 = 32, 200
    p4, q4 = _make_probs(jax.random.PRNGKey(2), B4, C4)
    out4 = jensen_shannon(p4, q4)
    jax.block_until_ready(out4)
    ref4 = jensen_shannon_ref(p4, q4)
    assert jnp.allclose(out4, ref4, atol=2e-5, rtol=1e-4), (out4, ref4)

    print("KERNEL_OK")
</pallas_src>

<mosaic_0001>
module attributes {stable_mosaic.version = 11 : i64} {
  func.func @_js_kernel_full(%arg0: i32, %arg1: memref<8x128xf32, #tpu.memory_space<vmem>>, %arg2: memref<8x128xf32, #tpu.memory_space<vmem>>, %arg3: memref<8x1xf32, #tpu.memory_space<vmem>>) attributes {dimension_semantics = [#tpu.dimension_semantics<parallel>], iteration_bounds = array<i64: 1>, scalar_prefetch = 0 : i64, scratch_operands = 0 : i64, tpu.core_type = #tpu.core_type<tc>, window_params = [{transform_indices = @transform_0, window_bounds = array<i64: 8, 128>}, {transform_indices = @transform_1, window_bounds = array<i64: 8, 128>}, {transform_indices = @transform_2, window_bounds = array<i64: 8, 1>}]} {
    %c0 = arith.constant 0 : index
    %c0_0 = arith.constant 0 : index
    %0 = vector.load %arg1[%c0, %c0_0] : memref<8x128xf32, #tpu.memory_space<vmem>>, vector<8x128xf32>
    %c0_1 = arith.constant 0 : index
    %c0_2 = arith.constant 0 : index
    %1 = vector.load %arg2[%c0_1, %c0_2] : memref<8x128xf32, #tpu.memory_space<vmem>>, vector<8x128xf32>
    %2 = arith.addf %0, %1 : vector<8x128xf32>
    %cst = arith.constant 5.000000e-01 : f32
    %3 = vector.broadcast %cst : f32 to vector<8x128xf32>
    %4 = arith.mulf %3, %2 : vector<8x128xf32>
    %cst_3 = arith.constant 1.000000e-10 : f32
    %5 = vector.broadcast %cst_3 : f32 to vector<8x128xf32>
    %6 = arith.addf %4, %5 : vector<8x128xf32>
    %7 = math.log %6 : vector<8x128xf32>
    %cst_4 = arith.constant 1.000000e-10 : f32
    %8 = vector.broadcast %cst_4 : f32 to vector<8x128xf32>
    %9 = arith.addf %0, %8 : vector<8x128xf32>
    %10 = math.log %9 : vector<8x128xf32>
    %11 = arith.mulf %0, %10 : vector<8x128xf32>
    %cst_5 = arith.constant 1.000000e-10 : f32
    %12 = vector.broadcast %cst_5 : f32 to vector<8x128xf32>
    %13 = arith.addf %1, %12 : vector<8x128xf32>
    %14 = math.log %13 : vector<8x128xf32>
    %15 = arith.mulf %1, %14 : vector<8x128xf32>
    %16 = arith.addf %11, %15 : vector<8x128xf32>
    %17 = arith.mulf %2, %7 : vector<8x128xf32>
    %18 = arith.subf %16, %17 : vector<8x128xf32>
    %cst_6 = arith.constant dense<0.000000e+00> : vector<8xf32>
    %19 = vector.multi_reduction <add>, %18, %cst_6 [1] : vector<8x128xf32> to vector<8xf32>
    %20 = vector.shape_cast %19 : vector<8xf32> to vector<8x1xf32>
    %cst_7 = arith.constant 5.000000e-01 : f32
    %21 = vector.broadcast %cst_7 : f32 to vector<8x1xf32>
    %22 = arith.mulf %21, %20 : vector<8x1xf32>
    %c0_8 = arith.constant 0 : index
    %c0_9 = arith.constant 0 : index
    %23 = vector.load %arg3[%c0_8, %c0_9] : memref<8x1xf32, #tpu.memory_space<vmem>>, vector<8x1xf32>
    tpu.vector_store %arg3[%c0_8, %c0_9], %22 {strides = array<i32>} : memref<8x1xf32, #tpu.memory_space<vmem>>, vector<8x1xf32>,
    return
  }
  func.func @transform_0(%arg0: i32) -> (i32, i32) {
    %c0_i32 = arith.constant 0 : i32
    %c0_i32_0 = arith.constant 0 : i32
    return %arg0, %c0_i32 : i32, i32
  }
  func.func @transform_1(%arg0: i32) -> (i32, i32) {
    %c0_i32 = arith.constant 0 : i32
    %c0_i32_0 = arith.constant 0 : i32
    return %arg0, %c0_i32 : i32, i32
  }
  func.func @transform_2(%arg0: i32) -> (i32, i32) {
    %c0_i32 = arith.constant 0 : i32
    %c0_i32_0 = arith.constant 0 : i32
    return %arg0, %c0_i32 : i32, i32
  }
}

</mosaic_0001>

<bundles_post_ra>
// kernel: tpu_custom_call.1
= control target key start
LH: loop header
LB: loop body
LE: loop exit
PB: predicated region body
PF: predicated region fallthrough
CT: control target
= control target key end

     0   :  { %7 = vsyncpa [#allocation3], 0  ;;  %s164_s0 = inlined_call_operand.hbm [shape: f32[8,128], index: 0, kind: input, shape index: {}]   ;;  %s165_s1 = inlined_call_operand.hbm [shape: f32[8,128], index: 1, kind: input, shape index: {}]   ;;  %s166_s2 = inlined_call_operand.vmem [shape: f32[8,1], index: 2, kind: output, shape index: {}]  }
   0x1   :  { %8 = vsyncpa [#allocation5], 0  ;;  %s120_s9 = smov [#allocation2]   ;;  %s121_s11 = smov [#allocation4]  }
   0x2   :  { %s15_s10 = sshll.u32 %s120_s9, 4  ;;  %s25_s12 = sshll.u32 %s121_s11, 4  ;;  %s16_s10 = int_to_ptr.vmem [resolvable:$true] %s15_s10  ;;  %s26_s12 = int_to_ptr.vmem [resolvable:$true] %s25_s12 }
   0x3   :  { %s72_s15 = scalar_lea.hbm %s164_s0, 128 }
   0x4   :  { %p73_p0 = scmp.ne.s32.totalorder %s164_s0, %s72_s15  ;;  %p76_p1 = scmp.lt.u32.totalorder %s72_s15, %s164_s0 }
   0x6   :  { %p78_p2 = pnand %p76_p1, %p73_p0 }
   0x8   :  { %81 = shalt.err (!%p78_p2)
}
   0x9   :  { %s82_s20 = scalar_lea.vmem %s16_s10, 128  ;;  %p87_p4 = scmp.lt.s32.totalorder %s16_s10, %s16_s10 }
   0xa   :  { %p83_p3 = scmp.ne.s32.totalorder %s16_s10, %s82_s20  ;;  %p88_p5 = scmp.lt.s32.totalorder %s82_s20, %s82_s20 }
   0xc   :  { %p89_p6 = por %p88_p5, %p87_p4 }
   0xe   :  { %p90_p7 = pnand %p89_p6, %p83_p3 }
  0x10   :  { %93 = shalt.err (!%p90_p7)
}
  0x11   :  { %18 = dma.hbm_to_vmem [thread:$0]  %s164_s0, 128, %s16_s10, [#allocation3]  }
  0x12   :  { %s94_s25 = scalar_lea.hbm %s165_s1, 128 }
  0x13   :  { %p95_p8 = scmp.ne.s32.totalorder %s165_s1, %s94_s25  ;;  %p98_p9 = scmp.lt.u32.totalorder %s94_s25, %s165_s1 }
  0x15   :  { %p100_p10 = pnand %p98_p9, %p95_p8 }
  0x17   :  { %103 = shalt.err (!%p100_p10)
}
  0x18   :  { %s104_s30 = scalar_lea.vmem %s26_s12, 128  ;;  %p109_p12 = scmp.lt.s32.totalorder %s26_s12, %s26_s12 }
  0x19   :  { %p105_p11 = scmp.ne.s32.totalorder %s26_s12, %s104_s30  ;;  %p110_p13 = scmp.lt.s32.totalorder %s104_s30, %s104_s30 }
  0x1b   :  { %p111_p0 = por %p110_p13, %p109_p12 }
  0x1d   :  { %p112_p1 = pnand %p111_p0, %p105_p11 }
  0x1f   :  { %115 = shalt.err (!%p112_p1)
}
  0x20   :  { %28 = dma.hbm_to_vmem [thread:$0]  %s165_s1, 128, %s26_s12, [#allocation5]  }
  0x21   :  { %116 = dma.done.wait [#allocation3], 128  }
  0x22   :  { %117 = vsyncadd [#allocation3], 4294967168 }
  0x23   :  { %118 = dma.done.wait [#allocation5], 128  }
  0x24   :  { %119 = vsyncadd [#allocation5], 4294967168  ;;  %v35_v0 = vld [vmem:[#allocation2] sm:$0xff]  ;;  %v36_v1 = vld [vmem:[#allocation4] sm:$0xff]  ;;  %vm56_vm0 = vcmask 7168  }
  0x25   :  { %v37_v2 = vadd.f32 %v36_v1, %v35_v0  ;;  %v42_v3 = vadd.f32 1e-10, %v35_v0  ;;  %v46_v4 = vadd.f32 1e-10, %v36_v1 }
  0x27   :  { %v38_v5 = vmul.f32 0.5, %v37_v2  ;;  %66 = vlog2.f32 %v42_v3 }
  0x28   :  { %68 = vlog2.f32 %v46_v4 }
  0x29   :  { %v39_v6 = vadd.f32 1e-10, %v38_v5 }
  0x2b   :  { %70 = vlog2.f32 %v39_v6 }
  0x31   :  { %v67_v7 = vpop.eup %66 }
  0x32   :  { %v69_v8 = vpop.eup %68  ;;  %v44_v9 = vmul.f32 0.6931472, %v67_v7 }
  0x33   :  { %v48_v10 = vmul.f32 0.6931472, %v69_v8 }
  0x34   :  { %v45_v11 = vmul.f32 %v44_v9, %v35_v0 }
  0x35   :  { %v71_v12 = vpop.eup %70  ;;  %v49_v13 = vmul.f32 %v48_v10, %v36_v1 }
  0x36   :  { %v41_v14 = vmul.f32 0.6931472, %v71_v12 }
  0x37   :  { %v50_v15 = vadd.f32 %v49_v13, %v45_v11 }
  0x38   :  { %v51_v16 = vmul.f32 %v41_v14, %v37_v2 }
  0x3a   :  { %v52_v17 = vsub.f32 %v50_v15, %v51_v16 }
  0x3c   :  { %53 = vadd.xlane.f32.xlu0 %v52_v17 }
  0xc9   :  { %v54_v18 = vpop.xlane.xlu0 %53 }
  0xca   :  { %v55_v19 = vmul.f32 0.5, %v54_v18 }
  0xcc   :  { %57 = vst.msk [vmem:[%s166_s2] sm:$0xff] %vm56_vm0, %v55_v19 }
  0xcd   :  { %62 = vsyncpa [#allocation3], 1 }
  0xce   :  { %63 = vsyncpa [#allocation5], 1 }

</bundles_post_ra>
